<compile_context>
chip_gen: v5e
topology: v5e:2x2
jax: 0.10.0
libtpu: 0.0.40
codegen_flags: <defaults>
</compile_context>

<pallas_src>
import jax
import jax.numpy as jnp
from jax.experimental import pallas as pl
from jax.experimental.pallas import tpu as pltpu


# ---------------------------------------------------------------------------
# helpers
# ---------------------------------------------------------------------------

def _round_up(n, m):
    return ((n + m - 1) // m) * m


def _cdiv(a, b):
    return (a + b - 1) // b


def _sublane(dtype):
    # sublane granularity: 8 rows for 4-byte, 16 for 2-byte, 32 for 1-byte
    return max(8, 32 // jnp.dtype(dtype).itemsize)


def _device_kind():
    try:
        return jax.devices()[0].device_kind.lower()
    except Exception:
        return ""


def _default_lane():
    """Feature-dim padding granularity: 256 on v6e/v7x (256x256 MXU), 128 otherwise."""
    kind = _device_kind()
    if ("v6" in kind) or ("v7" in kind) or ("tpu7" in kind):
        return 256
    return 128


def _vmem_capacity_bytes():
    try:
        return int(pltpu.get_tpu_info().vmem_capacity_bytes)
    except Exception:
        pass
    kind = _device_kind()
    if ("v7" in kind) or ("tpu7" in kind):
        return 64 * 1024 * 1024
    return 128 * 1024 * 1024


def _buffered_spec(block_shape, index_map, buffer_count):
    """BlockSpec with an explicit pipeline buffer count (graceful fallback)."""
    try:
        return pl.BlockSpec(block_shape, index_map,
                            pipeline_mode=pl.Buffered(buffer_count))
    except Exception:  # older jax without pipeline_mode / pl.Buffered
        return pl.BlockSpec(block_shape, index_map)


# ---------------------------------------------------------------------------
# kernels
# ---------------------------------------------------------------------------

def _negation_kernel_resident(x_ref, w1_ref, b1_ref, w2_ref, b2_ref, o_ref):
    """out = relu(x @ W1 + b1) @ W2 + b2; weights fully resident in VMEM."""
    x = x_ref[...].astype(w1_ref.dtype)                 # match MXU operand dtypes
    h = jnp.dot(x, w1_ref[...], preferred_element_type=jnp.float32)
    h = jnp.maximum(h + b1_ref[...], 0.0)               # bias + ReLU in f32 (VPU)
    y = jnp.dot(h.astype(w2_ref.dtype), w2_ref[...],
                preferred_element_type=jnp.float32)
    o_ref[...] = (y + b2_ref[...]).astype(o_ref.dtype)


def _negation_kernel_streamed(x_ref, w1_ref, b1_ref, w2_ref, b2_ref, o_ref,
                              acc_ref):
    """Hidden-dim streamed variant: weights arrive as (dim_p, tk)/(tk, dim_p) slabs.

    grid = (batch tiles, hidden tiles). For hidden slab j:
        h_j  = relu(x @ W1[:, j] + b1[j])      (tm, tk)
        acc += h_j @ W2[j, :]                  (tm, dim_p) f32
    Init at j == 0, finalize (add b2, cast, store) at the last slab.
    """
    j = pl.program_id(1)

    @pl.when(j == 0)
    def _():
        acc_ref[...] = jnp.zeros_like(acc_ref)

    x = x_ref[...].astype(w1_ref.dtype)
    h = jnp.dot(x, w1_ref[...], preferred_element_type=jnp.float32)
    h = jnp.maximum(h + b1_ref[...], 0.0)
    acc_ref[...] += jnp.dot(h.astype(w2_ref.dtype), w2_ref[...],
                            preferred_element_type=jnp.float32)

    @pl.when(j == pl.num_programs(1) - 1)
    def _():
        o_ref[...] = (acc_ref[...] + b2_ref[...]).astype(o_ref.dtype)


# ---------------------------------------------------------------------------
# parameter prep + forward
# ---------------------------------------------------------------------------

def prepare_negation_params(w1, b1, w2, b2, *, param_dtype=None, lane=None):
    """One-time parameter prep (call once at init, NOT per forward).

    Takes PyTorch-convention Linear params (weight: [out, in], bias: [out]),
    transposes weights to [in, out] and zero-pads the feature dim to a multiple
    of the lane width (256 on v6e/v7x, 128 otherwise). Biases stay f32.
    Pass param_dtype=jnp.bfloat16 to trade a little precision for ~3-4x MXU
    throughput and half the weight VMEM on v6e/v7x.
    """
    w1 = jnp.asarray(w1)
    w2 = jnp.asarray(w2)
    b1 = jnp.asarray(b1)
    b2 = jnp.asarray(b2)
    dim = w1.shape[0]
    if lane is None:
        lane = _default_lane()
    dim_p = _round_up(dim, lane)
    pad = dim_p - dim
    if param_dtype is None:
        param_dtype = w1.dtype

    def pad_w(w):
        wt = w.T.astype(param_dtype)                     # [out, in] -> [in, out]
        return jnp.pad(wt, ((0, pad), (0, pad)))

    def pad_b(b):
        return jnp.pad(b.astype(jnp.float32), (0, pad)).reshape(1, dim_p)

    return {"dim": dim, "dim_p": dim_p, "lane": lane,
            "w1": pad_w(w1), "b1": pad_b(b1),
            "w2": pad_w(w2), "b2": pad_b(b2)}


def negation_forward(x, params, *, tm=None, tk=None, force_stream=False):
    """Pallas forward: relu(x @ W1^T + b1) @ W2^T + b2.

    x: [B, dim]; params from prepare_negation_params. Returns [B, dim], x.dtype.
    """
    x = jnp.asarray(x)
    B, dim = x.shape
    assert dim == params["dim"], "feature dim mismatch with prepared params"
    dim_p = params["dim_p"]
    w1, b1, w2, b2 = params["w1"], params["b1"], params["w2"], params["b2"]

    x_item = x.dtype.itemsize
    out_item = x_item
    w_item = w1.dtype.itemsize
    sub = _sublane(x.dtype)
    cap = int(_vmem_capacity_bytes() * 0.85)   # headroom for Mosaic internals

    # Only the feature dim is padded (zero weight rows/cols + zero biases ->
    # padded output lanes are exactly zero). The batch dim uses a cdiv grid
    # with a partial final block instead of an HBM-copying jnp.pad.
    xp = x if dim_p == dim else jnp.pad(x, ((0, 0), (0, dim_p - dim)))

    # ---- batch-tile choice ------------------------------------------------
    # per-row VMEM bytes of one batch tile: x/out double-buffered, f32 h and y
    # intermediates, operand-dtype casts of x and h.
    per_row = dim_p * (2 * x_item + 2 * out_item + 4 + 4 + 2 * w_item)
    resident_fixed = 2 * dim_p * dim_p * w_item + 2 * dim_p * 4  # W1+W2 (1 buf) + biases

    if tm is None:
        # aim for >= ~8 grid steps on large batches (2 v7x TCs x >=2-deep
        # pipeline), exact single block on small ones
        tm_req = min(512, _round_up(max(_cdiv(B, 8), sub), sub))
    else:
        tm_req = _round_up(max(tm, sub), sub)

    tm_r = tm_req
    budget_r = max(cap - resident_fixed, 2 << 20)
    while tm_r > sub and tm_r * per_row > budget_r:
        tm_r = max(sub, _round_up(tm_r // 2, sub))

    use_stream = (force_stream or (tk is not None)
                  or resident_fixed + tm_r * per_row > cap)

    flops = 4 * B * dim_p * dim_p
    bytes_accessed = (B * dim_p * (x_item + out_item)
                      + 2 * dim_p * dim_p * w_item + 2 * dim_p * 4)
    cost = pl.CostEstimate(flops=flops, transcendentals=0,
                           bytes_accessed=bytes_accessed)

    if not use_stream:
        if tm_r >= B:
            tm_r = B                       # full-batch block: always legal, no overhang
        grid_m = _cdiv(B, tm_r)
        vmem_limit = int(min(cap, max(resident_fixed + tm_r * per_row + (2 << 20),
                                      16 << 20)))
        out = pl.pallas_call(
            _negation_kernel_resident,
            out_shape=jax.ShapeDtypeStruct((B, dim_p), x.dtype),
            grid_spec=pltpu.PrefetchScalarGridSpec(
                num_scalar_prefetch=0,
                grid=(grid_m,),
                in_specs=[
                    pl.BlockSpec((tm_r, dim_p), lambda i: (i, 0)),          # x tile
                    _buffered_spec((dim_p, dim_p), lambda i: (0, 0), 1),    # W1 resident
                    _buffered_spec((1, dim_p), lambda i: (0, 0), 1),        # b1 (f32)
                    _buffered_spec((dim_p, dim_p), lambda i: (0, 0), 1),    # W2 resident
                    _buffered_spec((1, dim_p), lambda i: (0, 0), 1),        # b2 (f32)
                ],
                out_specs=pl.BlockSpec((tm_r, dim_p), lambda i: (i, 0)),
            ),
            compiler_params=pltpu.CompilerParams(
                dimension_semantics=("parallel",),
                vmem_limit_bytes=vmem_limit,
            ),
            cost_estimate=cost,
        )(xp, w1, b1, w2, b2)
    else:
        # ---- hidden-dim streaming: weights arrive in double-buffered slabs ----
        if tk is None or (dim_p % tk) or (tk % 128):
            want = tk if tk is not None else 512
            cand = sorted({dim_p // n for n in range(1, dim_p // 128 + 1)
                           if dim_p % n == 0 and (dim_p // n) % 128 == 0})
            fits = [c for c in cand if c <= want]
            tk = max(fits) if fits else min(cand)

        def stream_bytes(tm_, tk_):
            return (2 * 2 * dim_p * tk_ * w_item            # W1 + W2 slabs, 2 bufs each
                    + 2 * (tk_ + dim_p) * 4                 # bias slabs
                    + tm_ * dim_p * (2 * x_item + 2 * out_item + 4 + w_item)
                    + tm_ * tk_ * (4 + w_item))              # h slab f32 + cast

        tm_s = tm_req
        while tm_s > sub and stream_bytes(tm_s, tk) > cap:
            tm_s = max(sub, _round_up(tm_s // 2, sub))
        if tm_s >= B:
            tm_s = B
        grid_m = _cdiv(B, tm_s)
        grid_h = dim_p // tk
        vmem_limit = int(min(cap, max(stream_bytes(tm_s, tk) + (2 << 20), 16 << 20)))
        out = pl.pallas_call(
            _negation_kernel_streamed,
            out_shape=jax.ShapeDtypeStruct((B, dim_p), x.dtype),
            grid_spec=pltpu.PrefetchScalarGridSpec(
                num_scalar_prefetch=0,
                grid=(grid_m, grid_h),
                in_specs=[
                    pl.BlockSpec((tm_s, dim_p), lambda i, j: (i, 0)),   # x (resident over j)
                    pl.BlockSpec((dim_p, tk), lambda i, j: (0, j)),     # W1 slab
                    pl.BlockSpec((1, tk), lambda i, j: (0, j)),         # b1 slab
                    pl.BlockSpec((tk, dim_p), lambda i, j: (j, 0)),     # W2 slab
                    _buffered_spec((1, dim_p), lambda i, j: (0, 0), 1),  # b2 (constant)
                ],
                out_specs=pl.BlockSpec((tm_s, dim_p), lambda i, j: (i, 0)),
                scratch_shapes=[pltpu.VMEM((tm_s, dim_p), jnp.float32)],
            ),
            compiler_params=pltpu.CompilerParams(
                dimension_semantics=("parallel", "arbitrary"),
                vmem_limit_bytes=vmem_limit,
            ),
            cost_estimate=cost,
        )(xp, w1, b1, w2, b2)

    if dim_p != dim:
        out = out[:, :dim]
    return out


def xavier_uniform(key, shape, dtype=jnp.float32):
    # PyTorch nn.init.xavier_uniform_ for a Linear weight of shape (out, in):
    # bound = sqrt(6 / (fan_in + fan_out))
    fan_out, fan_in = shape
    bound = (6.0 / (fan_in + fan_out)) ** 0.5
    return jax.random.uniform(key, shape, dtype, minval=-bound, maxval=bound)


if __name__ == "__main__":
    dim = 32
    batch = 8

    key = jax.random.PRNGKey(0)
    kx, kw1, kb1, kw2, kb2 = jax.random.split(key, 5)

    x = jax.random.normal(kx, (batch, dim), dtype=jnp.float32)

    # Parameter init mirroring the PyTorch module: xavier_uniform_ weights,
    # default PyTorch Linear biases U(-1/sqrt(in), 1/sqrt(in)).
    w1 = xavier_uniform(kw1, (dim, dim))
    w2 = xavier_uniform(kw2, (dim, dim))
    b_bound = 1.0 / (dim ** 0.5)
    b1 = jax.random.uniform(kb1, (dim,), jnp.float32, minval=-b_bound, maxval=b_bound)
    b2 = jax.random.uniform(kb2, (dim,), jnp.float32, minval=-b_bound, maxval=b_bound)

    # One-time parameter prep (transpose + lane padding), then forward.
    params = prepare_negation_params(w1, b1, w2, b2)
    out = jax.block_until_ready(negation_forward(x, params))

    ref = jnp.maximum(x @ w1.T + b1, 0.0) @ w2.T + b2
    assert out.shape == (batch, dim)
    assert jnp.allclose(out, ref, atol=1e-5, rtol=1e-5)

    # bf16 smoke check: native bf16 MXU operands with f32 accumulation, ragged
    # (non-divisible) batch handled without any batch padding.
    xb = x[:5].astype(jnp.bfloat16)
    params_bf16 = prepare_negation_params(
        w1.astype(jnp.bfloat16), b1, w2.astype(jnp.bfloat16), b2)
    out_bf16 = jax.block_until_ready(negation_forward(xb, params_bf16))
    ref_bf16 = jnp.maximum(xb.astype(jnp.float32) @ w1.T + b1, 0.0) @ w2.T + b2
    assert out_bf16.shape == (5, dim)
    assert out_bf16.dtype == jnp.bfloat16
    assert jnp.allclose(out_bf16.astype(jnp.float32), ref_bf16,
                        atol=1e-1, rtol=1e-1)

    # Hidden-dim streamed path (auto-selected when both dim_p x dim_p weights
    # stop fitting VMEM, e.g. large dim on v7x); forced here at a small shape
    # purely as a correctness check of the accumulator pipeline.
    dim_s, batch_s = 384, 16
    ks = jax.random.split(jax.random.PRNGKey(1), 5)
    xs = jax.random.normal(ks[0], (batch_s, dim_s), dtype=jnp.float32)
    w1s = xavier_uniform(ks[1], (dim_s, dim_s))
    w2s = xavier_uniform(ks[2], (dim_s, dim_s))
    bsb = 1.0 / (dim_s ** 0.5)
    b1s = jax.random.uniform(ks[3], (dim_s,), jnp.float32, minval=-bsb, maxval=bsb)
    b2s = jax.random.uniform(ks[4], (dim_s,), jnp.float32, minval=-bsb, maxval=bsb)
    params_s = prepare_negation_params(w1s, b1s, w2s, b2s)
    out_s = jax.block_until_ready(
        negation_forward(xs, params_s, force_stream=True, tk=128))
    ref_s = jnp.maximum(xs @ w1s.T + b1s, 0.0) @ w2s.T + b2s
    assert out_s.shape == (batch_s, dim_s)
    assert jnp.allclose(out_s, ref_s, atol=1e-4, rtol=1e-4)

    print("KERNEL_OK")
</pallas_src>

<mosaic_0001>
module attributes {stable_mosaic.version = 11 : i64} {
  func.func @_negation_kernel_resident(%arg0: i32, %arg1: memref<8x128xf32, #tpu.memory_space<vmem>>, %arg2: memref<128x128xf32, #tpu.memory_space<vmem>>, %arg3: memref<1x128xf32, #tpu.memory_space<vmem>>, %arg4: memref<128x128xf32, #tpu.memory_space<vmem>>, %arg5: memref<1x128xf32, #tpu.memory_space<vmem>>, %arg6: memref<8x128xf32, #tpu.memory_space<vmem>>) attributes {dimension_semantics = [#tpu.dimension_semantics<parallel>], iteration_bounds = array<i64: 1>, scalar_prefetch = 0 : i64, scratch_operands = 0 : i64, tpu.core_type = #tpu.core_type<tc>, window_params = [{transform_indices = @transform_0, window_bounds = array<i64: 8, 128>}, {pipeline_mode = #tpu.pipeline_mode<synchronous>, transform_indices = @transform_1, window_bounds = array<i64: 128, 128>}, {pipeline_mode = #tpu.pipeline_mode<synchronous>, transform_indices = @transform_2, window_bounds = array<i64: 1, 128>}, {pipeline_mode = #tpu.pipeline_mode<synchronous>, transform_indices = @transform_3, window_bounds = array<i64: 128, 128>}, {pipeline_mode = #tpu.pipeline_mode<synchronous>, transform_indices = @transform_4, window_bounds = array<i64: 1, 128>}, {transform_indices = @transform_5, window_bounds = array<i64: 8, 128>}]} {
    %c0 = arith.constant 0 : index
    %c0_0 = arith.constant 0 : index
    %0 = vector.load %arg1[%c0, %c0_0] : memref<8x128xf32, #tpu.memory_space<vmem>>, vector<8x128xf32>
    %c0_1 = arith.constant 0 : index
    %c0_2 = arith.constant 0 : index
    %1 = vector.load %arg2[%c0_1, %c0_2] : memref<128x128xf32, #tpu.memory_space<vmem>>, vector<128x128xf32>
    %cst = arith.constant dense<0.000000e+00> : vector<8x128xf32>
    %2 = tpu.matmul %0, %1, %cst {dimension_numbers = #tpu.dot_dimension_numbers<[1], [0], [0], [1], [0, 0, 1, 1], [], []>} : vector<8x128xf32>, vector<128x128xf32>, vector<8x128xf32> -> vector<8x128xf32>
    %c0_3 = arith.constant 0 : index
    %c0_4 = arith.constant 0 : index
    %3 = vector.load %arg3[%c0_3, %c0_4] : memref<1x128xf32, #tpu.memory_space<vmem>>, vector<1x128xf32>
    %4 = vector.broadcast %3 : vector<1x128xf32> to vector<8x128xf32>
    %5 = arith.addf %2, %4 : vector<8x128xf32>
    %cst_5 = arith.constant 0.000000e+00 : f32
    %6 = vector.broadcast %cst_5 : f32 to vector<8x128xf32>
    %7 = arith.maximumf %5, %6 : vector<8x128xf32>
    %c0_6 = arith.constant 0 : index
    %c0_7 = arith.constant 0 : index
    %8 = vector.load %arg4[%c0_6, %c0_7] : memref<128x128xf32, #tpu.memory_space<vmem>>, vector<128x128xf32>
    %cst_8 = arith.constant dense<0.000000e+00> : vector<8x128xf32>
    %9 = tpu.matmul %7, %8, %cst_8 {dimension_numbers = #tpu.dot_dimension_numbers<[1], [0], [0], [1], [0, 0, 1, 1], [], []>} : vector<8x128xf32>, vector<128x128xf32>, vector<8x128xf32> -> vector<8x128xf32>
    %c0_9 = arith.constant 0 : index
    %c0_10 = arith.constant 0 : index
    %10 = vector.load %arg5[%c0_9, %c0_10] : memref<1x128xf32, #tpu.memory_space<vmem>>, vector<1x128xf32>
    %11 = vector.broadcast %10 : vector<1x128xf32> to vector<8x128xf32>
    %12 = arith.addf %9, %11 : vector<8x128xf32>
    %c0_11 = arith.constant 0 : index
    %c0_12 = arith.constant 0 : index
    %13 = vector.load %arg6[%c0_11, %c0_12] : memref<8x128xf32, #tpu.memory_space<vmem>>, vector<8x128xf32>
    tpu.vector_store %arg6[%c0_11, %c0_12], %12 {strides = array<i32>} : memref<8x128xf32, #tpu.memory_space<vmem>>, vector<8x128xf32>,
    return
  }
  func.func @transform_0(%arg0: i32) -> (i32, i32) {
    %c0_i32 = arith.constant 0 : i32
    %c0_i32_0 = arith.constant 0 : i32
    return %arg0, %c0_i32 : i32, i32
  }
  func.func @transform_1(%arg0: i32) -> (i32, i32) {
    %c0_i32 = arith.constant 0 : i32
    %c0_i32_0 = arith.constant 0 : i32
    %c0_i32_1 = arith.constant 0 : i32
    return %c0_i32, %c0_i32_0 : i32, i32
  }
  func.func @transform_2(%arg0: i32) -> (i32, i32) {
    %c0_i32 = arith.constant 0 : i32
    %c0_i32_0 = arith.constant 0 : i32
    %c0_i32_1 = arith.constant 0 : i32
    return %c0_i32, %c0_i32_0 : i32, i32
  }
  func.func @transform_3(%arg0: i32) -> (i32, i32) {
    %c0_i32 = arith.constant 0 : i32
    %c0_i32_0 = arith.constant 0 : i32
    %c0_i32_1 = arith.constant 0 : i32
    return %c0_i32, %c0_i32_0 : i32, i32
  }
  func.func @transform_4(%arg0: i32) -> (i32, i32) {
    %c0_i32 = arith.constant 0 : i32
    %c0_i32_0 = arith.constant 0 : i32
    %c0_i32_1 = arith.constant 0 : i32
    return %c0_i32, %c0_i32_0 : i32, i32
  }
  func.func @transform_5(%arg0: i32) -> (i32, i32) {
    %c0_i32 = arith.constant 0 : i32
    %c0_i32_0 = arith.constant 0 : i32
    return %arg0, %c0_i32 : i32, i32
  }
}

</mosaic_0001>

<bundles_post_ra>
// kernel: tpu_custom_call.1
= control target key start
LH: loop header
LB: loop body
LE: loop exit
PB: predicated region body
PF: predicated region fallthrough
CT: control target
= control target key end

     0   :  { %10 = vsyncpa [#allocation3], 0  ;;  %s331_s0 = inlined_call_operand.hbm [shape: f32[8,128], index: 0, kind: input, shape index: {}]   ;;  %s332_s1 = inlined_call_operand.hbm [shape: f32[128,128], index: 1, kind: input, shape index: {}]   ;;  %s333_s2 = inlined_call_operand.vmem [shape: f32[1,128], index: 2, kind: input, shape index: {}]   ;;  %s334_s3 = inlined_call_operand.hbm [shape: f32[128,128], index: 3, kind: input, shape index: {}]   ;;  %s335_s4 = inlined_call_operand.vmem [shape: f32[1,128], index: 4, kind: input, shape index: {}]   ;;  %s336_s5 = inlined_call_operand.hbm [shape: f32[8,128], index: 5, kind: output, shape index: {}]  }
   0x1   :  { %11 = vsyncpa [#allocation6], 0  ;;  %s28_s20 = sshll.u32 %s332_s1, 4  ;;  %s29_s20 = int_to_ptr.hbm [resolvable:$true] %s28_s20 }
   0x2   :  { %12 = vsyncpa [#allocation4], 0  ;;  %s277_s21 = smov [#allocation5]   ;;  %s18_s25 = sshll.u32 %s331_s0, 4  ;;  %s19_s25 = int_to_ptr.hbm [resolvable:$true] %s18_s25 }
   0x3   :  { %s30_s22 = sshll.u32 %s277_s21, 4  ;;  %s278_s26 = smov 128   ;;  %s31_s22 = int_to_ptr.vmem [resolvable:$true] %s30_s22 }
   0x4   :  { %s279_s27 = smov 8   ;;  %s280_s28 = smov [#allocation2]  }
   0x5   :  { %36 = dma.hbm_to_vmem [thread:$0]  %s29_s20, 2048, %s31_s22, [#allocation6], %s278_s26, %s278_s26, %s279_s27  }
   0x6   :  { %s20_s29 = sshll.u32 %s280_s28, 4  ;;  %s43_s7 = sshll.u32 %s334_s3, 4  ;;  %s21_s29 = int_to_ptr.vmem [resolvable:$true] %s20_s29  ;;  %s44_s7 = int_to_ptr.hbm [resolvable:$true] %s43_s7 }
   0x7   :  { %23 = dma.hbm_to_vmem [thread:$0]  %s19_s25, 128, %s21_s29, [#allocation3]  }
   0x8   :  { %s281_s1 = smov [#allocation7]  }
   0x9   :  { %s45_s8 = sshll.u32 %s281_s1, 4  ;;  %s46_s8 = int_to_ptr.vmem [resolvable:$true] %s45_s8 }
   0xa   :  { %51 = dma.hbm_to_vmem [thread:$0]  %s44_s7, 2048, %s46_s8, [#allocation6], %s278_s26, %s278_s26, %s279_s27  }
   0xb   :  { %271 = dma.done.wait [#allocation3], 128  }
   0xc   :  { %272 = vsyncadd [#allocation3], 4294967168 }
   0xd   :  { %273 = dma.done.wait [#allocation6], 4096  }
   0xe   :  { %274 = vsyncadd [#allocation6], 4294963200  ;;  %v82_v0 = vld [vmem:[#allocation5 + $0x78] sm:$0xff]  ;;  %v81_v1 = vld [vmem:[#allocation5 + $0x70] sm:$0xff]  ;;  %s282_s11 = smov [#allocation8]   ;;  %s156_s15 = sshll.u32 %s336_s5, 4  ;;  %s157_s15 = int_to_ptr.hbm [resolvable:$true] %s156_s15 }
   0xf   :  { %87 = vmatpush.msra.mxu0 %v82_v0  ;;  %v80_v2 = vld [vmem:[#allocation5 + $0x68] sm:$0xff]  ;;  %v79_v3 = vld [vmem:[#allocation5 + $0x60] sm:$0xff]  ;;  %v123_v4 = vld [vmem:[#allocation7 + $0x78] sm:$0xff]  ;;  %s154_s12 = sshll.u32 %s282_s11, 4  ;;  %s155_s12 = int_to_ptr.vmem [resolvable:$true] %s154_s12 }
  0x10   :  { %v78_v5 = vld [vmem:[#allocation5 + $0x58] sm:$0xff]  ;;  %128 = vmatpush.msra.mxu1 %v123_v4  ;;  %v122_v6 = vld [vmem:[#allocation7 + $0x70] sm:$0xff]  ;;  %v121_v7 = vld [vmem:[#allocation7 + $0x68] sm:$0xff] }
  0x11   :  { %88 = vmatpush.msra.mxu0 %v81_v1  ;;  %v77_v8 = vld [vmem:[#allocation5 + $0x50] sm:$0xff]  ;;  %v120_v9 = vld [vmem:[#allocation7 + $0x60] sm:$0xff]  ;;  %v76_v10 = vld [vmem:[#allocation5 + $0x48] sm:$0xff] }
  0x12   :  { %129 = vmatpush.msra.mxu1 %v122_v6  ;;  %v119_v11 = vld [vmem:[#allocation7 + $0x58] sm:$0xff]  ;;  %v75_v12 = vld [vmem:[#allocation5 + $0x40] sm:$0xff]  ;;  %v118_v13 = vld [vmem:[#allocation7 + $0x50] sm:$0xff] }
  0x13   :  { %89 = vmatpush.msra.mxu0 %v80_v2  ;;  %v74_v14 = vld [vmem:[#allocation5 + $0x38] sm:$0xff]  ;;  %v117_v15 = vld [vmem:[#allocation7 + $0x48] sm:$0xff]  ;;  %v73_v16 = vld [vmem:[#allocation5 + $0x30] sm:$0xff] }
  0x14   :  { %130 = vmatpush.msra.mxu1 %v121_v7  ;;  %v116_v17 = vld [vmem:[#allocation7 + $0x40] sm:$0xff]  ;;  %v72_v18 = vld [vmem:[#allocation5 + $0x28] sm:$0xff]  ;;  %v115_v19 = vld [vmem:[#allocation7 + $0x38] sm:$0xff] }
  0x15   :  { %90 = vmatpush.msra.mxu0 %v79_v3  ;;  %v71_v20 = vld [vmem:[#allocation5 + $0x20] sm:$0xff]  ;;  %v114_v21 = vld [vmem:[#allocation7 + $0x30] sm:$0xff]  ;;  %v70_v22 = vld [vmem:[#allocation5 + $0x18] sm:$0xff] }
  0x16   :  { %131 = vmatpush.msra.mxu1 %v120_v9  ;;  %v113_v23 = vld [vmem:[#allocation7 + $0x28] sm:$0xff]  ;;  %v69_v24 = vld [vmem:[#allocation5 + $0x10] sm:$0xff]  ;;  %v112_v25 = vld [vmem:[#allocation7 + $0x20] sm:$0xff] }
  0x17   :  { %91 = vmatpush.msra.mxu0 %v78_v5  ;;  %v68_v26 = vld [vmem:[#allocation5 + $0x8] sm:$0xff]  ;;  %v111_v27 = vld [vmem:[#allocation7 + $0x18] sm:$0xff]  ;;  %v67_v28 = vld [vmem:[#allocation5] sm:$0xff] }
  0x18   :  { %132 = vmatpush.msra.mxu1 %v119_v11  ;;  %v66_v29 = vld [vmem:[#allocation2] sm:$0xff]  ;;  %v110_v30 = vld [vmem:[#allocation7 + $0x10] sm:$0xff]  ;;  %v109_v31 = vld [vmem:[#allocation7 + $0x8] sm:$0xff] }
  0x19   :  { %92 = vmatpush.msra.mxu0 %v77_v8  ;;  %v108_v32 = vld [vmem:[#allocation7] sm:$0xff]  ;;  %v173_v33 = vld [vmem:[%s333_s2] ss:$0 sm:$0xff] }
  0x1a   :  { %133 = vmatpush.msra.mxu1 %v118_v13  ;;  %v174_v37 = vld [vmem:[%s335_s4] ss:$0 sm:$0xff] }
  0x1b   :  { %93 = vmatpush.msra.mxu0 %v76_v10 }
  0x1c   :  { %134 = vmatpush.msra.mxu1 %v117_v15 }
  0x1d   :  { %94 = vmatpush.msra.mxu0 %v75_v12 }
  0x1e   :  { %135 = vmatpush.msra.mxu1 %v116_v17 }
  0x1f   :  { %95 = vmatpush.msra.mxu0 %v74_v14 }
  0x20   :  { %136 = vmatpush.msra.mxu1 %v115_v19 }
  0x21   :  { %96 = vmatpush.msra.mxu0 %v73_v16 }
  0x22   :  { %137 = vmatpush.msra.mxu1 %v114_v21 }
  0x23   :  { %97 = vmatpush.msra.mxu0 %v72_v18 }
  0x24   :  { %138 = vmatpush.msra.mxu1 %v113_v23 }
  0x25   :  { %98 = vmatpush.msra.mxu0 %v71_v20 }
  0x26   :  { %139 = vmatpush.msra.mxu1 %v112_v25 }
  0x27   :  { %99 = vmatpush.msra.mxu0 %v70_v22 }
  0x28   :  { %140 = vmatpush.msra.mxu1 %v111_v27 }
  0x29   :  { %100 = vmatpush.msra.mxu0 %v69_v24 }
  0x2a   :  { %141 = vmatpush.msra.mxu1 %v110_v30 }
  0x2b   :  { %101 = vmatpush.msra.mxu0 %v68_v26 }
  0x2c   :  { %142 = vmatpush.msra.mxu1 %v109_v31 }
  0x2d   :  { %102 = vmatpush.msra.mxu0 %v67_v28 }
  0x2e   :  { %103 = vmatmul.f32.vlgmr.msra.gmra.mxu0 %v66_v29  ;;  %143 = vmatpush.msra.mxu1 %v108_v32 }
  0xab   :  { %v104_v34 = vpop.f32.mrf.mxu0 }
  0xac   :  { %v105_v35 = vadd.f32 %v173_v33, %v104_v34 }
  0xae   :  { %v107_v36 = vmax.f32 %v105_v35, 0.0 }
  0xb0   :  { %144 = vmatmul.f32.vlgmr.msra.gmra.mxu1 %v107_v36 }
 0x12d   :  { %v145_v38 = vpop.f32.mrf.mxu1 }
 0x12e   :  { %v146_v39 = vadd.f32 %v174_v37, %v145_v38 }
 0x130   :  { %148 = vst [vmem:[#allocation8] sm:$0xff] %v146_v39 }
 0x131   :  { %159 = dma.vmem_to_hbm [thread:$0]  %s155_s12, 128, %s157_s15, [#allocation4]  }
 0x132   :  { %275 = dma.done.wait [#allocation4], 128  }
 0x133   :  { %276 = vsyncadd [#allocation4], 4294967168 }
 0x134   :  { %164 = vsyncpa [#allocation3], 1 }
 0x135   :  { %165 = vsyncpa [#allocation6], 1 }
 0x136   :  { %166 = vsyncpa [#allocation4], 1 }

</bundles_post_ra>
